<compile_context>
chip_gen: v6e
topology: v6e:2x2x1
jax: 0.10.0
libtpu: 0.0.40
codegen_flags: <defaults>
</compile_context>

<pallas_src>
import functools
import math

import jax
import jax.numpy as jnp
from jax.experimental import pallas as pl
from jax.experimental.pallas import tpu as pltpu


def _cdiv(a: int, b: int) -> int:
    return -(-a // b)


def _floor_to(x: int, m: int) -> int:
    return (x // m) * m


def _mean_readout_kernel(seq_ref, out_ref, acc_ref, *,
                         n_valid: int, per_split: int, slab_rows: int,
                         group: int, n_total: int, apply_act: bool):
    """grid = (n_split [parallel], d_tiles [parallel], row_tiles [arbitrary])."""
    s = pl.program_id(0)
    i = pl.program_id(2)

    @pl.when(i == 0)
    def _init():
        acc_ref[...] = jnp.zeros_like(acc_ref)

    tile_n, tile_d = seq_ref.shape
    # Logical (unclamped) first packed row covered by this block.
    row0 = (s * per_split + i) * tile_n

    def _accum(off, rows, masked):
        x = seq_ref[pl.ds(off, rows), :].astype(jnp.float32)         # (rows, tile_d)
        if masked:
            rid = jax.lax.broadcasted_iota(jnp.int32, (rows, tile_d), 0)
            x = jnp.where(row0 + off + rid < n_valid, x, 0.0)
        # Sublane-aligned slab sum: pure VPU adds; the `group`-row blocks line
        # up with the accumulator's sublanes, so no per-step cross-sublane
        # reduction is generated.
        acc_ref[...] += jnp.sum(x.reshape(rows // group, group, tile_d), axis=0)

    def _sweep(masked):
        n_slabs, rem = divmod(tile_n, slab_rows)
        pairs, odd = divmod(n_slabs, 2)
        if pairs > 0:                       # manually 2x-unrolled slab loop
            def body(t, carry):
                base = pl.multiple_of(t * (2 * slab_rows), slab_rows)
                _accum(base, slab_rows, masked)
                _accum(base + slab_rows, slab_rows, masked)
                return carry
            jax.lax.fori_loop(0, pairs, body, 0)
        if odd:
            _accum(pairs * 2 * slab_rows, slab_rows, masked)
        if rem:
            _accum(n_slabs * slab_rows, rem, masked)

    in_bounds = row0 + tile_n <= n_valid    # is this whole block valid rows?

    @pl.when(in_bounds)
    def _full():
        _sweep(masked=False)

    @pl.when(jnp.logical_not(in_bounds))
    def _ragged():
        _sweep(masked=True)

    @pl.when(i == pl.num_programs(2) - 1)
    def _finalize():
        total = jnp.sum(acc_ref[...], axis=0, keepdims=True)         # (1, tile_d)
        if apply_act:
            mean = total * (1.0 / n_total)
            total = 1.0 / (1.0 + jnp.exp(-mean))   # sigmoid (== jax.nn.sigmoid)
        out_ref[...] = total.reshape(1, 1, tile_d).astype(out_ref.dtype)


def mean_readout(seq: jax.Array, *, tile_n: int | None = None,
                 vmem_budget_bytes: int = 24 * 1024 * 1024) -> jax.Array:
    """sigmoid(mean over axis 0) of an (N, ...) array -> (...,)."""
    n = seq.shape[0]
    assert n >= 1
    feat_shape = seq.shape[1:]
    d = int(math.prod(feat_shape)) if feat_shape else 1
    out_dtype = seq.dtype
    itemsize = seq.dtype.itemsize
    align = {4: 8, 2: 16, 1: 32}.get(itemsize, 8)

    x = seq.reshape(n, d)                                 # free view

    # --- lane-dense packing for small D (free reshape; needs k | N) ---------
    k = 1
    if 0 < d < 128 and 128 % d == 0:
        k = 128 // d
        while k > 1 and n % k != 0:
            k //= 2
    dp = d * k
    n_pack = n // k                                       # exact (k | n)
    packed = x.reshape(n_pack, dp)                        # free view, no copy

    # --- column (lane) tiling: full width unless VMEM forces a split --------
    per_buf = vmem_budget_bytes // 2                      # double-buffered input
    tile_d = dp
    if dp % 128 == 0:
        want_rows = max(align, min(256, n_pack))
        if want_rows * dp * itemsize > per_buf:
            m = dp // 128
            tile_d = 128
            for div in range(m, 0, -1):                   # largest divisor that fits
                if m % div == 0 and want_rows * 128 * div * itemsize <= per_buf:
                    tile_d = 128 * div
                    break
    num_d_tiles = dp // tile_d

    # --- row tiling: VMEM-budget-driven (no artificial row cap) -------------
    cap_rows = max(align, _floor_to(per_buf // (tile_d * itemsize), align))
    if tile_n is None:
        tile_n = cap_rows
    else:
        tile_n = max(align, _floor_to(tile_n, align))
    if n_pack >= align:
        tile_n = min(tile_n, _floor_to(n_pack, align))
        group = 8
    else:
        tile_n = n_pack                                   # tiny input: full dim
        group = 8 if tile_n % 8 == 0 else 1

    num_row_tiles = _cdiv(n_pack, tile_n)
    n_split = 2 if num_row_tiles >= 2 else 1              # both TCs stream on v7x
    per_split = _cdiv(num_row_tiles, n_split)
    needs_clamp = n_split * per_split != num_row_tiles    # phantom trailing block

    # --- inner slab: <= 64 KiB live f32, multiple of the 8-row group --------
    if group == 8:
        slab_rows = max(8, _floor_to(65536 // (tile_d * 4), 8))
    else:
        slab_rows = tile_n
    assert tile_n % group == 0 and slab_rows % group == 0

    apply_act = (k == 1 and n_split == 1)
    out_dt = out_dtype if apply_act else jnp.float32

    if needs_clamp:
        # The phantom block re-maps onto the last real block (in-bounds DMA);
        # its contribution is fully masked away inside the kernel.
        def in_map(s, j, i):
            return (jnp.minimum(s * per_split + i, num_row_tiles - 1), j)
    else:
        def in_map(s, j, i):
            return (s * per_split + i, j)

    out = pl.pallas_call(
        functools.partial(_mean_readout_kernel, n_valid=n_pack,
                          per_split=per_split, slab_rows=slab_rows,
                          group=group, n_total=n, apply_act=apply_act),
        out_shape=jax.ShapeDtypeStruct((n_split, 1, dp), out_dt),
        grid_spec=pltpu.PrefetchScalarGridSpec(
            num_scalar_prefetch=0,
            grid=(n_split, num_d_tiles, per_split),       # reduction axis last
            in_specs=[pl.BlockSpec((tile_n, tile_d), in_map)],
            out_specs=pl.BlockSpec((1, 1, tile_d), lambda s, j, i: (s, 0, j)),
            scratch_shapes=[pltpu.VMEM((group, tile_d), jnp.float32)],
        ),
        compiler_params=pltpu.CompilerParams(
            dimension_semantics=("parallel", "parallel", "arbitrary"),
            vmem_limit_bytes=32 * 1024 * 1024,
        ),
        cost_estimate=pl.CostEstimate(
            flops=n * d + 4 * d,
            transcendentals=d,
            bytes_accessed=n_pack * dp * itemsize
                           + n_split * dp * jnp.dtype(out_dt).itemsize,
        ),
    )(packed)

    if apply_act:
        res = out.reshape(d)                              # already sigmoided
    else:
        col = out.reshape(n_split, dp).sum(axis=0)        # fold N splits (f32)
        col = col.reshape(k, d).sum(axis=0)               # fold lane packing
        res = jax.nn.sigmoid(col * (1.0 / n)).astype(out_dtype)
    return res.reshape(feat_shape) if feat_shape else res.reshape(())


if __name__ == "__main__":
    key = jax.random.PRNGKey(0)

    # DGI readout shapes: seq length 8, hidden 32 (lane-packed path).
    N, D = 8, 32
    seq = jax.random.normal(key, (N, D), dtype=jnp.float32)
    out = mean_readout(seq)
    jax.block_until_ready(out)
    ref = jax.nn.sigmoid(jnp.mean(seq, axis=0))
    assert out.shape == (D,)
    assert jnp.allclose(out, ref, atol=1e-5, rtol=1e-5)

    # Extra coverage (all tiny):
    #  * (520, 256) tile_n=128 -> 5 row tiles, 2-way split, masked ragged tail
    #    + one phantom (clamped) block, wrapper-side sigmoid.
    #  * (256, 1024)           -> single tile, in-kernel sigmoid.
    #  * (1000, 32) tile_n=64  -> lane-packed + multi-tile + masked tail.
    #  * (1001, 32)            -> ragged N with no pack factor (k=1, D < 128).
    #  * (100, 256) bf16       -> 16-row alignment + masked tail.
    cases = [((520, 256), 128, jnp.float32, 1e-5),
             ((256, 1024), None, jnp.float32, 1e-5),
             ((1000, 32), 64, jnp.float32, 1e-5),
             ((1001, 32), None, jnp.float32, 1e-5),
             ((100, 256), None, jnp.bfloat16, 2e-2)]
    for idx, (shape, tn, dt, tol) in enumerate(cases):
        xk = jax.random.normal(jax.random.PRNGKey(idx + 1), shape,
                               dtype=jnp.float32).astype(dt)
        got = mean_readout(xk, tile_n=tn)
        jax.block_until_ready(got)
        want = jax.nn.sigmoid(jnp.mean(xk.astype(jnp.float32), axis=0)).astype(dt)
        assert got.shape == (shape[1],), (shape, got.shape)
        assert jnp.allclose(got.astype(jnp.float32), want.astype(jnp.float32),
                            atol=tol, rtol=tol), shape

    print("KERNEL_OK")
</pallas_src>

<mosaic_0001>
module attributes {stable_mosaic.version = 11 : i64} {
  func.func @_mean_readout_kernel(%arg0: i32, %arg1: i32, %arg2: i32, %arg3: memref<2x128xf32, #tpu.memory_space<vmem>>, %arg4: memref<1x1x128xf32, #tpu.memory_space<vmem>>, %arg5: memref<1x128xf32, #tpu.memory_space<vmem>>) attributes {dimension_semantics = [#tpu.dimension_semantics<parallel>, #tpu.dimension_semantics<parallel>, #tpu.dimension_semantics<arbitrary>], iteration_bounds = array<i64: 1, 1, 1>, scalar_prefetch = 0 : i64, scratch_operands = 1 : i64, tpu.core_type = #tpu.core_type<tc>, window_params = [{transform_indices = @transform_0, window_bounds = array<i64: 2, 128>}, {transform_indices = @transform_1, window_bounds = array<i64: 1, 1, 128>}]} {
    %c0_i32 = arith.constant 0 : i32
    %0 = arith.cmpi eq, %arg2, %c0_i32 : i32
    %1 = arith.extui %0 : i1 to i32
    %c0_i32_0 = arith.constant 0 : i32
    %2 = arith.cmpi ne, %1, %c0_i32_0 : i32
    scf.if %2 {
      %cst = arith.constant 0.000000e+00 : f32
      %16 = vector.broadcast %cst : f32 to vector<1x128xf32>
      %c0 = arith.constant 0 : index
      %c0_7 = arith.constant 0 : index
      %17 = vector.load %arg5[%c0, %c0_7] : memref<1x128xf32, #tpu.memory_space<vmem>>, vector<1x128xf32>
      tpu.vector_store %arg5[%c0, %c0_7], %16 {strides = array<i32>} : memref<1x128xf32, #tpu.memory_space<vmem>>, vector<1x128xf32>,
    } else {
    }
    %c1_i32 = arith.constant 1 : i32
    %3 = arith.muli %arg0, %c1_i32 : i32
    %4 = arith.addi %3, %arg2 : i32
    %c2_i32 = arith.constant 2 : i32
    %5 = arith.muli %4, %c2_i32 : i32
    %c2_i32_1 = arith.constant 2 : i32
    %6 = arith.addi %5, %c2_i32_1 : i32
    %c2_i32_2 = arith.constant 2 : i32
    %7 = arith.cmpi sle, %6, %c2_i32_2 : i32
    %8 = arith.extui %7 : i1 to i32
    %c0_i32_3 = arith.constant 0 : i32
    %9 = arith.cmpi ne, %8, %c0_i32_3 : i32
    scf.if %9 {
      %c0 = arith.constant 0 : index
      %c0_7 = arith.constant 0 : index
      %16 = vector.load %arg3[%c0, %c0_7] : memref<2x128xf32, #tpu.memory_space<vmem>>, vector<2x128xf32>
      %c0_8 = arith.constant 0 : index
      %c0_9 = arith.constant 0 : index
      %17 = vector.load %arg5[%c0_8, %c0_9] : memref<1x128xf32, #tpu.memory_space<vmem>>, vector<1x128xf32>
      %18 = vector.shape_cast %16 : vector<2x128xf32> to vector<2x1x128xf32>
      %cst = arith.constant dense<0.000000e+00> : vector<1x128xf32>
      %19 = vector.multi_reduction <add>, %18, %cst [0] : vector<2x1x128xf32> to vector<1x128xf32>
      %20 = arith.addf %17, %19 : vector<1x128xf32>
      %c0_10 = arith.constant 0 : index
      %c0_11 = arith.constant 0 : index
      %21 = vector.load %arg5[%c0_10, %c0_11] : memref<1x128xf32, #tpu.memory_space<vmem>>, vector<1x128xf32>
      tpu.vector_store %arg5[%c0_10, %c0_11], %20 {strides = array<i32>} : memref<1x128xf32, #tpu.memory_space<vmem>>, vector<1x128xf32>,
    } else {
    }
    %true = arith.constant true
    %10 = arith.xori %7, %true : i1
    %11 = arith.extui %10 : i1 to i32
    %c0_i32_4 = arith.constant 0 : i32
    %12 = arith.cmpi ne, %11, %c0_i32_4 : i32
    scf.if %12 {
      %c0 = arith.constant 0 : index
      %c0_7 = arith.constant 0 : index
      %16 = vector.load %arg3[%c0, %c0_7] : memref<2x128xf32, #tpu.memory_space<vmem>>, vector<2x128xf32>
      %17 = tpu.iota {dimensions = array<i32: 0>} : vector<2x128xi32>
      %c0_i32_8 = arith.constant 0 : i32
      %18 = arith.addi %5, %c0_i32_8 : i32
      %19 = vector.broadcast %18 : i32 to vector<2x128xi32>
      %20 = arith.addi %19, %17 : vector<2x128xi32>
      %c2_i32_9 = arith.constant 2 : i32
      %21 = vector.broadcast %c2_i32_9 : i32 to vector<2x128xi32>
      %22 = arith.cmpi slt, %20, %21 : vector<2x128xi32>
      %cst = arith.constant 0.000000e+00 : f32
      %23 = vector.broadcast %cst : f32 to vector<2x128xf32>
      %24 = arith.select %22, %16, %23 : vector<2x128xi1>, vector<2x128xf32>
      %c0_10 = arith.constant 0 : index
      %c0_11 = arith.constant 0 : index
      %25 = vector.load %arg5[%c0_10, %c0_11] : memref<1x128xf32, #tpu.memory_space<vmem>>, vector<1x128xf32>
      %26 = vector.shape_cast %24 : vector<2x128xf32> to vector<2x1x128xf32>
      %cst_12 = arith.constant dense<0.000000e+00> : vector<1x128xf32>
      %27 = vector.multi_reduction <add>, %26, %cst_12 [0] : vector<2x1x128xf32> to vector<1x128xf32>
      %28 = arith.addf %25, %27 : vector<1x128xf32>
      %c0_13 = arith.constant 0 : index
      %c0_14 = arith.constant 0 : index
      %29 = vector.load %arg5[%c0_13, %c0_14] : memref<1x128xf32, #tpu.memory_space<vmem>>, vector<1x128xf32>
      tpu.vector_store %arg5[%c0_13, %c0_14], %28 {strides = array<i32>} : memref<1x128xf32, #tpu.memory_space<vmem>>, vector<1x128xf32>,
    } else {
    }
    %c0_i32_5 = arith.constant 0 : i32
    %13 = arith.cmpi eq, %arg2, %c0_i32_5 : i32
    %14 = arith.extui %13 : i1 to i32
    %c0_i32_6 = arith.constant 0 : i32
    %15 = arith.cmpi ne, %14, %c0_i32_6 : i32
    scf.if %15 {
      %c0 = arith.constant 0 : index
      %c0_7 = arith.constant 0 : index
      %16 = vector.load %arg5[%c0, %c0_7] : memref<1x128xf32, #tpu.memory_space<vmem>>, vector<1x128xf32>
      %cst = arith.constant dense<0.000000e+00> : vector<128xf32>
      %17 = vector.multi_reduction <add>, %16, %cst [0] : vector<1x128xf32> to vector<128xf32>
      %18 = vector.shape_cast %17 : vector<128xf32> to vector<1x128xf32>
      %19 = vector.shape_cast %18 : vector<1x128xf32> to vector<1x1x128xf32>
      %c0_8 = arith.constant 0 : index
      %c0_9 = arith.constant 0 : index
      %c0_10 = arith.constant 0 : index
      %20 = vector.load %arg4[%c0_8, %c0_9, %c0_10] : memref<1x1x128xf32, #tpu.memory_space<vmem>>, vector<1x1x128xf32>
      tpu.vector_store %arg4[%c0_8, %c0_9, %c0_10], %19 {strides = array<i32>} : memref<1x1x128xf32, #tpu.memory_space<vmem>>, vector<1x1x128xf32>,
    } else {
    }
    return
  }
  func.func @transform_0(%arg0: i32, %arg1: i32, %arg2: i32) -> (i32, i32) {
    %c1_i32 = arith.constant 1 : i32
    %0 = arith.muli %arg0, %c1_i32 : i32
    %1 = arith.addi %0, %arg2 : i32
    %c0_i32 = arith.constant 0 : i32
    return %1, %arg1 : i32, i32
  }
  func.func @transform_1(%arg0: i32, %arg1: i32, %arg2: i32) -> (i32, i32, i32) {
    %c0_i32 = arith.constant 0 : i32
    %c0_i32_0 = arith.constant 0 : i32
    return %arg0, %c0_i32, %arg1 : i32, i32, i32
  }
}

</mosaic_0001>

<bundles_post_ra>
// kernel: tpu_custom_call.1
= control target key start
LH: loop header
LB: loop body
LE: loop exit
PB: predicated region body
PF: predicated region fallthrough
CT: control target
= control target key end

     0   :  { %6 = vsyncpa [#allocation4], 0  ;;  %s205_s0 = inlined_call_operand.hbm [shape: f32[2,128], index: 0, kind: input, shape index: {}]   ;;  %s206_s1 = inlined_call_operand.hbm [shape: f32[1,1,128], index: 1, kind: output, shape index: {}]  }
   0x1   :  { %7 = vsyncpa [#allocation5], 0  ;;  %s185_s6 = smov [#allocation3]  }
   0x2   :  { %s17_s7 = sshll.u32 %s185_s6, 4  ;;  %s18_s7 = int_to_ptr.vmem [resolvable:$true] %s17_s7 }
   0x3   :  { %s149_s8 = scalar_lea.vmem %s18_s7, 32  ;;  %p154_p1 = scmp.lt.s32.totalorder %s18_s7, %s18_s7 }
   0x4   :  { %p150_p0 = scmp.ne.s32.totalorder %s18_s7, %s149_s8  ;;  %p155_p2 = scmp.lt.s32.totalorder %s149_s8, %s149_s8 }
   0x6   :  { %p156_p3 = por %p155_p2, %p154_p1 }
   0x8   :  { %p157_p4 = pnand %p156_p3, %p150_p0 }
   0xa   :  { %160 = shalt.err (!%p157_p4)
}
   0xb   :  { %20 = dma.hbm_to_vmem [thread:$0]  %s205_s0, 32, %s18_s7, [#allocation4]  }
   0xc   :  { %181 = dma.done.wait [#allocation4], 32  }
   0xd   :  { %182 = vsyncadd [#allocation4], 4294967264  ;;  %v51_v0 = vlaneseq  ;;  %v186_v1 = vmov 0.0   ;;  %v187_v2 = vmov 1966171168   ;;  %vm64_vm0 = vcmask 1040384  }
   0xe   :  { %29 = vst [vmem:[#allocation2] sm:$0x1] %v186_v1  ;;  %v49_v3 = vunpack.c.l.s4 %v187_v2  ;;  %v134_v7 = vld.sshfl [vmem:[#allocation3] sm:$0x11 pattern:$0x75316420] }
   0xf   :  { %v52_v4 = vshrl.u32 %v51_v0, 7  ;;  %v47_v8 = vcombine.high %v134_v7, %v134_v7  ;;  %s188_s0 = smov [#allocation6]  }
  0x10   :  { %v50_v5 = vunpack.c.0.s8 %v49_v3  ;;  %s125_s11 = sshll.u32 %s188_s0, 4  ;;  %s126_s11 = int_to_ptr.vmem [resolvable:$true] %s125_s11 }
  0x11   :  { %s161_s12 = scalar_lea.vmem %s126_s11, 16  ;;  %s165_s13 = scalar_lea.vmem %s126_s11, 32 }
  0x12   :  { %v53_v6 = vsub.s32 %v50_v5, %v52_v4  ;;  %p162_p5 = scmp.ne.s32.totalorder %s126_s11, %s161_s12  ;;  %p166_p6 = scmp.lt.s32.totalorder %s126_s11, %s126_s11 }
  0x13   :  { %p167_p7 = scmp.lt.s32.totalorder %s165_s13, %s161_s12 }
  0x14   :  { %v54_v9 = vrot.slane %v134_v7, %v53_v6  ;;  %v61_v10 = vrot.slane %v47_v8, %v53_v6 }
  0x15   :  { %v38_v12 = vld [vmem:[#allocation2] sm:$0x1]  ;;  %p168_p8 = por %p167_p7, %p166_p6 }
  0x16   :  { %v65_v11 = vsel %vm64_vm0, %v54_v9, 0.0  ;;  %v66_v13 = vsel %vm64_vm0, %v61_v10, 0.0 }
  0x17   :  { %v67_v14 = vadd.f32 %v66_v13, %v65_v11  ;;  %p169_p9 = pnand %p168_p8, %p162_p5 }
  0x19   :  { %v68_v15 = vadd.f32 %v67_v14, %v38_v12 }
  0x1b   :  { %69 = vst [vmem:[#allocation2] sm:$0x1] %v68_v15 }
  0x22   :  { %v116_v16 = vld [vmem:[#allocation2] sm:$0x1] }
  0x23   :  { %118 = vst [vmem:[#allocation6] sm:$0x1] %v116_v16 }
  0x24   :  { %172 = shalt.err (!%p169_p9)
}
  0x25   :  { %128 = dma.vmem_to_hbm [thread:$0]  %s126_s11, 16, %s206_s1, [#allocation5]  }
  0x26   :  { %183 = dma.done.wait [#allocation5], 16  }
  0x27   :  { %184 = vsyncadd [#allocation5], 4294967280 }
  0x28   :  { %132 = vsyncpa [#allocation4], 1 }
  0x29   :  { %133 = vsyncpa [#allocation5], 1 }

</bundles_post_ra>
